<compile_context>
chip_gen: v7x
topology: tpu7x:2x2x1
jax: 0.10.0
libtpu: 0.0.40
codegen_flags: <defaults>
</compile_context>

<pallas_src>
import jax
import jax.numpy as jnp
from jax import lax
from jax.experimental import pallas as pl
from jax.experimental.pallas import tpu as pltpu

_LANE = 128
_SUBLANE = 8
_TILE_ROWS_MAX = 4096  # (4096, 128) f32 tile = 2 MiB per input


def _ceil_to(x, m):
    return -(-x // m) * m


def _cdiv(a, b):
    return -(-a // b)


def _make_cox_kernel(shrink, tile_rows, tiles_per_chunk, n_valid, need_mask):
    """Build a kernel specialized on (shrink, tile geometry, masking)."""
    shrink = float(shrink)

    def kernel(g_case_ref, g_control_ref, out_ref):
        t = pl.program_id(1)  # inner streaming/reduction axis

        @pl.when(t == 0)
        def _init():
            out_ref[...] = jnp.zeros_like(out_ref)

        gc = g_case_ref[...].astype(jnp.float32)     # (tile_rows, 128)
        gx = g_control_ref[...].astype(jnp.float32)  # (tile_rows, 128)

        x = gx - gc
        # numerically-stable softplus: max(x, 0) + log1p(exp(-|x|))
        sp = jnp.maximum(x, 0.0) + jnp.log1p(jnp.exp(-jnp.abs(x)))
        if shrink != 0.0:
            contrib = sp + jnp.float32(shrink) * (jnp.abs(gc) + jnp.abs(gx))
        else:
            contrib = sp

        if need_mask:
            # Mask out lane padding, garbage rows of a partial last tile and
            # the (fully out-of-range) clamped "extra" tile, by global index.
            c = pl.program_id(0)
            tile_idx = c * tiles_per_chunk + t          # unclamped logical id
            base = tile_idx * (tile_rows * _LANE)
            row = lax.broadcasted_iota(jnp.int32, (tile_rows, _LANE), 0)
            lane = lax.broadcasted_iota(jnp.int32, (tile_rows, _LANE), 1)
            gidx = base + row * _LANE + lane
            contrib = jnp.where(gidx < n_valid, contrib, 0.0)

        # Vreg-wise (VPU-only) reduction to a full (8, 128) accumulator block.
        partial = contrib.reshape(tile_rows // _SUBLANE, _SUBLANE, _LANE).sum(axis=0)
        out_ref[...] += partial

    return kernel


def cox_loss(g_case, g_control, shrink):
    assert g_case.shape == g_control.shape
    shrink = float(shrink)
    n = int(g_case.size)
    assert n > 0

    gc = jnp.reshape(g_case, (-1,))     # native dtype; reshape is free
    gx = jnp.reshape(g_control, (-1,))

    # Minimal alignment: rows of 128 lanes, rounded up to a multiple of 8
    # sublanes (< 1024 pad elements worst case; zero copies when n % 1024 == 0).
    rows = _cdiv(n, _LANE)
    rows_p = _ceil_to(rows, _SUBLANE)
    pad = rows_p * _LANE - n
    if pad:
        gc = jnp.pad(gc, (0, pad))
        gx = jnp.pad(gx, (0, pad))
    gc2 = gc.reshape(rows_p, _LANE)
    gx2 = gx.reshape(rows_p, _LANE)

    # Grid: outer "parallel" chunk axis (2-way so v7x's two TensorCores each
    # stream half the rows; harmless on single-TC chips), inner "arbitrary"
    # streaming axis that accumulates into the chunk's (8, 128) output block.
    num_chunks = 2 if rows_p >= 2 * _SUBLANE else 1
    tile_rows = min(_TILE_ROWS_MAX, _ceil_to(_cdiv(rows_p, num_chunks), _SUBLANE))
    tiles_total = _cdiv(rows_p, tile_rows)
    tiles_per_chunk = _cdiv(tiles_total, num_chunks)

    covered = num_chunks * tiles_per_chunk * tile_rows * _LANE
    need_mask = covered != n

    if num_chunks * tiles_per_chunk == tiles_total:
        def data_map(c, t):
            return (c * tiles_per_chunk + t, 0)
    else:
        # At most one "extra" grid step; clamp its DMA to the last valid tile
        # (its contribution is fully masked out inside the kernel).
        def data_map(c, t):
            return (jnp.minimum(c * tiles_per_chunk + t, tiles_total - 1), 0)

    data_spec = pl.BlockSpec((tile_rows, _LANE), data_map)
    out_spec = pl.BlockSpec((_SUBLANE, _LANE), lambda c, t: (c, 0))

    kernel = _make_cox_kernel(shrink, tile_rows, tiles_per_chunk, n, need_mask)

    # VMEM budget: 2 inputs x 2 pipeline buffers x one tile, plus headroom.
    tile_bytes = tile_rows * _LANE * gc2.dtype.itemsize
    vmem_limit = max(8 << 20, 2 * 2 * tile_bytes + (4 << 20))

    partials = pl.pallas_call(
        kernel,
        out_shape=jax.ShapeDtypeStruct((num_chunks * _SUBLANE, _LANE), jnp.float32),
        grid_spec=pltpu.PrefetchScalarGridSpec(
            num_scalar_prefetch=0,
            grid=(num_chunks, tiles_per_chunk),
            in_specs=[data_spec, data_spec],
            out_specs=out_spec,
        ),
        compiler_params=pltpu.CompilerParams(
            dimension_semantics=("parallel", "arbitrary"),
            vmem_limit_bytes=int(vmem_limit),
        ),
    )(gc2, gx2)

    # sum(softplus + shrink*(|gc|+|gx|)) / n  ==  softplus.mean() + shrink*(...)
    return jnp.sum(partials) * jnp.float32(1.0 / n)


def _reference_cox_loss(g_case, g_control, shrink):
    gc = g_case.astype(jnp.float32)
    gx = g_control.astype(jnp.float32)
    x = gx - gc
    sp = jnp.maximum(x, 0.0) + jnp.log1p(jnp.exp(-jnp.abs(x)))
    loss = jnp.mean(sp)
    if shrink != 0:
        loss = loss + shrink * (jnp.mean(jnp.abs(gc)) + jnp.mean(jnp.abs(gx)))
    return loss


if __name__ == "__main__":
    key = jax.random.PRNGKey(0)
    k1, k2, k3, k4, k5, k6 = jax.random.split(key, 6)

    # Small case: a batch of scalar risk scores, as the module implies.
    batch = 128
    g_case = jax.random.normal(k1, (batch, 1), dtype=jnp.float32)
    g_control = jax.random.normal(k2, (batch, 1), dtype=jnp.float32)
    shrink = 0.1

    loss = jax.block_until_ready(cox_loss(g_case, g_control, shrink))
    ref = _reference_cox_loss(g_case, g_control, shrink)
    assert jnp.allclose(loss, ref, rtol=1e-5, atol=1e-5), (loss, ref)

    # shrink == 0 branch (regularizer term statically removed from the kernel).
    loss0 = jax.block_until_ready(cox_loss(g_case, g_control, 0.0))
    ref0 = _reference_cox_loss(g_case, g_control, 0.0)
    assert jnp.allclose(loss0, ref0, rtol=1e-5, atol=1e-5), (loss0, ref0)

    # Ragged medium case: 2 chunks, sub-cap tiles, minimal (<1 KiB) padding,
    # partial last tile handled by the in-kernel mask.
    n_med = 131_149
    gm_case = jax.random.normal(k3, (n_med, 1), dtype=jnp.float32)
    gm_control = jax.random.normal(k4, (n_med, 1), dtype=jnp.float32)
    loss_m = jax.block_until_ready(cox_loss(gm_case, gm_control, shrink))
    ref_m = _reference_cox_loss(gm_case, gm_control, shrink)
    assert jnp.allclose(loss_m, ref_m, rtol=1e-4, atol=1e-4), (loss_m, ref_m)

    # Larger case: full (4096, 128) tiles, odd tile count -> grid (2, 2) with
    # one clamped, fully-masked "extra" step; zero wrapper-side copies.
    n_big = 3 * 4096 * 128
    gb_case = jax.random.normal(k5, (n_big,), dtype=jnp.float32)
    gb_control = jax.random.normal(k6, (n_big,), dtype=jnp.float32)
    loss_b = jax.block_until_ready(cox_loss(gb_case, gb_control, shrink))
    ref_b = _reference_cox_loss(gb_case, gb_control, shrink)
    assert jnp.allclose(loss_b, ref_b, rtol=1e-4, atol=1e-4), (loss_b, ref_b)

    print("KERNEL_OK")
</pallas_src>

<mosaic_0001>
module attributes {stable_mosaic.version = 11 : i64} {
  func.func @kernel(%arg0: i32, %arg1: i32, %arg2: memref<8x128xf32, #tpu.memory_space<vmem>>, %arg3: memref<8x128xf32, #tpu.memory_space<vmem>>, %arg4: memref<8x128xf32, #tpu.memory_space<vmem>>) attributes {dimension_semantics = [#tpu.dimension_semantics<parallel>, #tpu.dimension_semantics<arbitrary>], iteration_bounds = array<i64: 1, 1>, scalar_prefetch = 0 : i64, scratch_operands = 0 : i64, tpu.core_type = #tpu.core_type<tc>, window_params = [{transform_indices = @transform_0, window_bounds = array<i64: 8, 128>}, {transform_indices = @transform_1, window_bounds = array<i64: 8, 128>}, {transform_indices = @transform_2, window_bounds = array<i64: 8, 128>}]} {
    %c0_i32 = arith.constant 0 : i32
    %0 = arith.cmpi eq, %arg1, %c0_i32 : i32
    %1 = arith.extui %0 : i1 to i32
    %c0_i32_0 = arith.constant 0 : i32
    %2 = arith.cmpi ne, %1, %c0_i32_0 : i32
    scf.if %2 {
      %cst_13 = arith.constant 0.000000e+00 : f32
      %39 = vector.broadcast %cst_13 : f32 to vector<8x128xf32>
      %c0_14 = arith.constant 0 : index
      %c0_15 = arith.constant 0 : index
      %40 = vector.load %arg4[%c0_14, %c0_15] : memref<8x128xf32, #tpu.memory_space<vmem>>, vector<8x128xf32>
      tpu.vector_store %arg4[%c0_14, %c0_15], %39 {strides = array<i32>} : memref<8x128xf32, #tpu.memory_space<vmem>>, vector<8x128xf32>,
    } else {
    }
    %c0 = arith.constant 0 : index
    %c0_1 = arith.constant 0 : index
    %3 = vector.load %arg2[%c0, %c0_1] : memref<8x128xf32, #tpu.memory_space<vmem>>, vector<8x128xf32>
    %c0_2 = arith.constant 0 : index
    %c0_3 = arith.constant 0 : index
    %4 = vector.load %arg3[%c0_2, %c0_3] : memref<8x128xf32, #tpu.memory_space<vmem>>, vector<8x128xf32>
    %5 = arith.subf %4, %3 : vector<8x128xf32>
    %cst = arith.constant 0.000000e+00 : f32
    %6 = vector.broadcast %cst : f32 to vector<8x128xf32>
    %7 = arith.maximumf %5, %6 : vector<8x128xf32>
    %8 = math.absf %5 : vector<8x128xf32>
    %cst_4 = arith.constant 0.000000e+00 : f32
    %9 = vector.broadcast %cst_4 : f32 to vector<8x128xf32>
    %10 = arith.subf %9, %8 : vector<8x128xf32>
    %11 = math.exp %10 : vector<8x128xf32>
    %12 = math.log1p %11 : vector<8x128xf32>
    %13 = arith.addf %7, %12 : vector<8x128xf32>
    %14 = math.absf %3 : vector<8x128xf32>
    %15 = math.absf %4 : vector<8x128xf32>
    %16 = arith.addf %14, %15 : vector<8x128xf32>
    %cst_5 = arith.constant 1.000000e-01 : f32
    %17 = vector.broadcast %cst_5 : f32 to vector<8x128xf32>
    %18 = arith.mulf %17, %16 : vector<8x128xf32>
    %19 = arith.addf %13, %18 : vector<8x128xf32>
    %c1_i32 = arith.constant 1 : i32
    %20 = arith.muli %arg0, %c1_i32 : i32
    %21 = arith.addi %20, %arg1 : i32
    %c1024_i32 = arith.constant 1024 : i32
    %22 = arith.muli %21, %c1024_i32 : i32
    %23 = tpu.iota {dimensions = array<i32: 0>} : vector<8x128xi32>
    %24 = tpu.iota {dimensions = array<i32: 1>} : vector<8x128xi32>
    %c128_i32 = arith.constant 128 : i32
    %25 = vector.broadcast %c128_i32 : i32 to vector<8x128xi32>
    %26 = arith.muli %23, %25 : vector<8x128xi32>
    %27 = vector.broadcast %22 : i32 to vector<8x128xi32>
    %28 = arith.addi %27, %26 : vector<8x128xi32>
    %29 = arith.addi %28, %24 : vector<8x128xi32>
    %c128_i32_6 = arith.constant 128 : i32
    %30 = vector.broadcast %c128_i32_6 : i32 to vector<8x128xi32>
    %31 = arith.cmpi slt, %29, %30 : vector<8x128xi32>
    %cst_7 = arith.constant 0.000000e+00 : f32
    %32 = vector.broadcast %cst_7 : f32 to vector<8x128xf32>
    %33 = arith.select %31, %19, %32 : vector<8x128xi1>, vector<8x128xf32>
    %34 = vector.shape_cast %33 : vector<8x128xf32> to vector<1x8x128xf32>
    %cst_8 = arith.constant dense<0.000000e+00> : vector<8x128xf32>
    %35 = vector.multi_reduction <add>, %34, %cst_8 [0] : vector<1x8x128xf32> to vector<8x128xf32>
    %c0_9 = arith.constant 0 : index
    %c0_10 = arith.constant 0 : index
    %36 = vector.load %arg4[%c0_9, %c0_10] : memref<8x128xf32, #tpu.memory_space<vmem>>, vector<8x128xf32>
    %37 = arith.addf %36, %35 : vector<8x128xf32>
    %c0_11 = arith.constant 0 : index
    %c0_12 = arith.constant 0 : index
    %38 = vector.load %arg4[%c0_11, %c0_12] : memref<8x128xf32, #tpu.memory_space<vmem>>, vector<8x128xf32>
    tpu.vector_store %arg4[%c0_11, %c0_12], %37 {strides = array<i32>} : memref<8x128xf32, #tpu.memory_space<vmem>>, vector<8x128xf32>,
    return
  }
  func.func @transform_0(%arg0: i32, %arg1: i32) -> (i32, i32) {
    %c1_i32 = arith.constant 1 : i32
    %0 = arith.muli %arg0, %c1_i32 : i32
    %1 = arith.addi %0, %arg1 : i32
    %c0_i32 = arith.constant 0 : i32
    %c0_i32_0 = arith.constant 0 : i32
    return %1, %c0_i32 : i32, i32
  }
  func.func @transform_1(%arg0: i32, %arg1: i32) -> (i32, i32) {
    %c1_i32 = arith.constant 1 : i32
    %0 = arith.muli %arg0, %c1_i32 : i32
    %1 = arith.addi %0, %arg1 : i32
    %c0_i32 = arith.constant 0 : i32
    %c0_i32_0 = arith.constant 0 : i32
    return %1, %c0_i32 : i32, i32
  }
  func.func @transform_2(%arg0: i32, %arg1: i32) -> (i32, i32) {
    %c0_i32 = arith.constant 0 : i32
    %c0_i32_0 = arith.constant 0 : i32
    return %arg0, %c0_i32 : i32, i32
  }
}

</mosaic_0001>

<bundles_post_ra>
// kernel: tpu_custom_call.1
= control target key start
LH: loop header
LB: loop body
LE: loop exit
PB: predicated region body
PF: predicated region fallthrough
CT: control target
= control target key end

     0   :  { %7 = vsyncpa [#allocation3], 0  ;;  %s238_s0 = inlined_call_operand.hbm [shape: f32[8,128], index: 0, kind: input, shape index: {}]   ;;  %s239_s1 = inlined_call_operand.hbm [shape: f32[8,128], index: 1, kind: input, shape index: {}]   ;;  %s240_s2 = inlined_call_operand.hbm [shape: f32[8,128], index: 2, kind: output, shape index: {}]  }
   0x1   :  { %8 = vsyncpa [#allocation6], 0 }
   0x2   :  { %9 = vsyncpa [#allocation4], 0  ;;  %s184_s9 = smov [#allocation2]   ;;  %s185_s11 = smov [#allocation5]  }
   0x3   :  { %s19_s10 = sshll.u32 %s184_s9, 4  ;;  %s32_s12 = sshll.u32 %s185_s11, 4  ;;  %s20_s10 = int_to_ptr.vmem [resolvable:$true] %s19_s10  ;;  %s33_s12 = int_to_ptr.vmem [resolvable:$true] %s32_s12 }
   0x4   :  { %s112_s15 = scalar_lea.hbm %s238_s0, 128 }
   0x5   :  { %p113_p0 = scmp.ne.s32.totalorder %s238_s0, %s112_s15  ;;  %p116_p1 = scmp.lt.u32.totalorder %s112_s15, %s238_s0 }
   0x7   :  { %p118_p2 = pnand %p116_p1, %p113_p0 }
   0x9   :  { %121 = shalt.err (!%p118_p2)
}
   0xa   :  { %s122_s20 = scalar_lea.vmem %s20_s10, 128  ;;  %p127_p4 = scmp.lt.s32.totalorder %s20_s10, %s20_s10 }
   0xb   :  { %p123_p3 = scmp.ne.s32.totalorder %s20_s10, %s122_s20  ;;  %p128_p5 = scmp.lt.s32.totalorder %s122_s20, %s122_s20 }
   0xd   :  { %p129_p6 = por %p128_p5, %p127_p4 }
   0xf   :  { %p130_p7 = pnand %p129_p6, %p123_p3 }
  0x11   :  { %133 = shalt.err (!%p130_p7)
}
  0x12   :  { %22 = dma.hbm_to_vmem [thread:$0]  %s238_s0, 128, %s20_s10, [#allocation3]  }
  0x13   :  { %s134_s25 = scalar_lea.hbm %s239_s1, 128 }
  0x14   :  { %p135_p8 = scmp.ne.s32.totalorder %s239_s1, %s134_s25  ;;  %p138_p9 = scmp.lt.u32.totalorder %s134_s25, %s239_s1 }
  0x16   :  { %p140_p10 = pnand %p138_p9, %p135_p8 }
  0x18   :  { %143 = shalt.err (!%p140_p10)
}
  0x19   :  { %s144_s30 = scalar_lea.vmem %s33_s12, 128  ;;  %p149_p12 = scmp.lt.s32.totalorder %s33_s12, %s33_s12 }
  0x1a   :  { %p145_p11 = scmp.ne.s32.totalorder %s33_s12, %s144_s30  ;;  %p150_p13 = scmp.lt.s32.totalorder %s144_s30, %s144_s30 }
  0x1c   :  { %p151_p0 = por %p150_p13, %p149_p12 }
  0x1e   :  { %p152_p1 = pnand %p151_p0, %p145_p11 }
  0x20   :  { %155 = shalt.err (!%p152_p1)
}
  0x21   :  { %35 = dma.hbm_to_vmem [thread:$0]  %s239_s1, 128, %s33_s12, [#allocation6]  }
  0x22   :  { %178 = dma.done.wait [#allocation3], 128  }
  0x23   :  { %179 = vsyncadd [#allocation3], 4294967168 }
  0x24   :  { %180 = dma.done.wait [#allocation6], 128  }
  0x25   :  { %181 = vsyncadd [#allocation6], 4294967168  ;;  %v49_v0 = vld [vmem:[#allocation2] sm:$0xff]  ;;  %v50_v1 = vld [vmem:[#allocation5] sm:$0xff]  ;;  %v74_v8 = vlaneseq  ;;  %s186_s1 = smov [#allocation7]  }
  0x26   :  { %v51_v2 = vsub.f32 %v50_v1, %v49_v0  ;;  %v67_v11 = vand.u32 2147483647, %v49_v0  ;;  %v68_v12 = vand.u32 2147483647, %v50_v1  ;;  %s94_s4 = sshll.u32 %s186_s1, 4  ;;  %s95_s4 = int_to_ptr.vmem [resolvable:$true] %s94_s4 }
  0x27   :  { %v75_v10 = vshrl.u32 %v74_v8, 7  ;;  %v77_v15 = vand.u32 127, %v74_v8  ;;  %s156_s5 = scalar_lea.vmem %s95_s4, 128  ;;  %p161_p3 = scmp.lt.s32.totalorder %s95_s4, %s95_s4 }
  0x28   :  { %v53_v3 = vand.u32 2147483647, %v51_v2  ;;  %v69_v17 = vadd.f32 %v68_v12, %v67_v11  ;;  %v52_v20 = vmax.f32 %v51_v2, 0.0  ;;  %p157_p2 = scmp.ne.s32.totalorder %s95_s4, %s156_s5  ;;  %p162_p4 = scmp.lt.s32.totalorder %s156_s5, %s156_s5 }
  0x29   :  { %v78_v16 = vmul.u32 128, %v75_v10 }
  0x2a   :  { %v54_v4 = vsub.f32 0.0, %v53_v3  ;;  %v70_v23 = vmul.f32 0.1, %v69_v17  ;;  %p163_p5 = por %p162_p4, %p161_p3 }
  0x2b   :  { %v81_v22 = vadd.s32 %v78_v16, %v77_v15 }
  0x2c   :  { %v55_v5 = vmul.f32 1.442695, %v54_v4  ;;  %p164_p6 = pnand %p163_p5, %p157_p2 }
  0x2d   :  { %vm82_vm1 = vcmp.lt.s32.totalorder %v81_v22, 128 }
  0x2e   :  { %108 = vpow2.f32 %v55_v5 }
  0x38   :  { %v109_v6 = vpop.eup %108 }
  0x39   :  { %v57_v7 = vadd.f32 1.0, %v109_v6  ;;  %v60_v9 = vmul.f32 -0.5, %v109_v6  ;;  %v63_v14 = vand.u32 2147483647, %v109_v6 }
  0x3b   :  { %110 = vlog2.f32 %v57_v7  ;;  %v61_v13 = vadd.f32 1.0, %v60_v9  ;;  %vm64_vm0 = vcmp.lt.f32.partialorder %v63_v14, 0.0004427343 }
  0x3d   :  { %v62_v18 = vmul.f32 %v109_v6, %v61_v13 }
  0x45   :  { %v111_v19 = vpop.eup %110 }
  0x46   :  { %v59_v21 = vmul.f32 0.6931472, %v111_v19 }
  0x48   :  { %v65_v24 = vsel %vm64_vm0, %v62_v18, %v59_v21 }
  0x49   :  { %v66_v25 = vadd.f32 %v65_v24, %v52_v20 }
  0x4b   :  { %v71_v26 = vadd.f32 %v70_v23, %v66_v25 }
  0x4d   :  { %v83_v27 = vsel %vm82_vm1, %v71_v26, 0.0 }
  0x4e   :  { %87 = vst [vmem:[#allocation7] sm:$0xff] %v83_v27 }
  0x4f   :  { %167 = shalt.err (!%p164_p6)
}
  0x50   :  { %s168_s8 = scalar_lea.hbm %s240_s2, 128 }
  0x51   :  { %p169_p7 = scmp.ne.s32.totalorder %s240_s2, %s168_s8  ;;  %p172_p8 = scmp.lt.u32.totalorder %s168_s8, %s240_s2 }
  0x53   :  { %p174_p9 = pnand %p172_p8, %p169_p7 }
  0x55   :  { %177 = shalt.err (!%p174_p9)
}
  0x56   :  { %97 = dma.vmem_to_hbm [thread:$0]  %s95_s4, 128, %s240_s2, [#allocation4]  }
  0x57   :  { %182 = dma.done.wait [#allocation4], 128  }
  0x58   :  { %183 = vsyncadd [#allocation4], 4294967168 }
  0x59   :  { %101 = vsyncpa [#allocation3], 1 }
  0x5a   :  { %102 = vsyncpa [#allocation6], 1 }
  0x5b   :  { %103 = vsyncpa [#allocation4], 1 }

</bundles_post_ra>
